<compile_context>
chip_gen: v6e
topology: v6e:2x2x1
jax: 0.10.0
libtpu: 0.0.40
codegen_flags: <defaults>
</compile_context>

<pallas_src>
import functools
import math

import jax
import jax.numpy as jnp
from jax.experimental import pallas as pl
from jax.experimental.pallas import tpu as pltpu

LN_EPS = 1e-12          # BERT LayerNorm eps
NEG_INF = -1e9
VMEM_LIMIT = 64 * 1024 * 1024


# ----------------------------- in-kernel helpers -----------------------------
def _layernorm_f32(x, g, b):
    x = x.astype(jnp.float32)
    mu = jnp.mean(x, axis=-1, keepdims=True)
    var = jnp.mean((x - mu) ** 2, axis=-1, keepdims=True)
    return (x - mu) * jax.lax.rsqrt(var + LN_EPS) * g + b


def _gelu_f32(x):
    # tanh-approx GELU in f32.
    # TODO(synk): switch to exact erf-based GELU to match HF BERT bit-for-bit.
    c = jnp.sqrt(2.0 / jnp.pi).astype(jnp.float32)
    return 0.5 * x * (1.0 + jnp.tanh(c * (x + 0.044715 * x * x * x)))


def _row_tile(S):
    for t in (256, 128):
        if S % t == 0:
            return t
    return S


# --------------------------------- kernels -----------------------------------
def emb_ln_kernel(x_ref, g_ref, b_ref, o_ref):
    # x_ref: (TS, H) f32 -> bf16 out
    o_ref[...] = _layernorm_f32(x_ref[...], g_ref[...], b_ref[...]).astype(o_ref.dtype)


def qkv_kernel(x_ref, w_ref, b_ref, o_ref):
    # fused QKV projection: (TS,H)bf16 @ (H,3H)bf16 -> f32 acc -> bf16
    acc = jnp.dot(x_ref[...], w_ref[...], preferred_element_type=jnp.float32)
    o_ref[...] = (acc + b_ref[...]).astype(o_ref.dtype)


def attn_kernel(q_ref, k_ref, v_ref, m_ref, o_ref, *, scale):
    # q: (nH, TQ, hd) bf16; k/v: (nH, S, hd) bf16; m: (1, S) f32
    q = q_ref[...]
    k = k_ref[...]
    v = v_ref[...]
    s = jnp.einsum("hqd,hkd->hqk", q, k, preferred_element_type=jnp.float32)
    s = s * scale + m_ref[...][None, :, :]            # mask add in f32
    mx = jnp.max(s, axis=-1, keepdims=True)
    e = jnp.exp(s - mx)
    denom = jnp.sum(e, axis=-1, keepdims=True)
    p = e * pl.reciprocal(denom, approx=True)         # EUP reciprocal
    ctx = jnp.einsum("hqk,hkd->hqd", p.astype(v.dtype), v,
                     preferred_element_type=jnp.float32)
    o_ref[...] = ctx.astype(o_ref.dtype)


def post_attn_ffn_kernel(x_ref, ctx_ref, wo_ref, bo_ref, ln1g_ref, ln1b_ref,
                         w1_ref, b1_ref, w2_ref, b2_ref, ln2g_ref, ln2b_ref,
                         o_ref):
    # attention output projection + residual + LN1 + FFN + residual + LN2
    attn = jnp.dot(ctx_ref[...], wo_ref[...],
                   preferred_element_type=jnp.float32) + bo_ref[...]
    h1 = _layernorm_f32(x_ref[...].astype(jnp.float32) + attn,
                        ln1g_ref[...], ln1b_ref[...])
    ff = _gelu_f32(jnp.dot(h1.astype(jnp.bfloat16), w1_ref[...],
                           preferred_element_type=jnp.float32) + b1_ref[...])
    y = jnp.dot(ff.astype(jnp.bfloat16), w2_ref[...],
                preferred_element_type=jnp.float32) + b2_ref[...]
    o_ref[...] = _layernorm_f32(h1 + y, ln2g_ref[...], ln2b_ref[...]).astype(o_ref.dtype)


def head_kernel(cls_ref, wp_ref, bp_ref, wc_ref, bc_ref, o_ref):
    # BERT pooler tanh(dense(CLS)) -> Dropout(0.3) eval == identity -> Linear.
    pooled = jnp.tanh(jnp.dot(cls_ref[...], wp_ref[...],
                              preferred_element_type=jnp.float32) + bp_ref[...])
    # TODO(synk): training-mode Dropout(p=0.3) via pltpu.prng_random_bits not
    # implemented; eval-mode dropout is identity.
    o_ref[...] = jnp.dot(pooled.astype(jnp.bfloat16), wc_ref[...],
                         preferred_element_type=jnp.float32) + bc_ref[...]


# --------------------------------- wrappers ----------------------------------
def _cparams(sem):
    return pltpu.CompilerParams(dimension_semantics=sem,
                                vmem_limit_bytes=VMEM_LIMIT)


def emb_layernorm(x, g, b):
    B, S, H = x.shape
    TS = _row_tile(S)
    nT = S // TS
    return pl.pallas_call(
        emb_ln_kernel,
        out_shape=jax.ShapeDtypeStruct((B, S, H), jnp.bfloat16),
        grid=(B, nT),
        in_specs=[pl.BlockSpec((pl.Squeezed(), TS, H), lambda i, t: (i, t, 0)),
                  pl.BlockSpec((1, H), lambda i, t: (0, 0)),
                  pl.BlockSpec((1, H), lambda i, t: (0, 0))],
        out_specs=pl.BlockSpec((pl.Squeezed(), TS, H), lambda i, t: (i, t, 0)),
        compiler_params=_cparams(("parallel", "parallel")),
    )(x, g, b)


def qkv_proj(x, w, b):
    B, S, H = x.shape
    O = w.shape[1]
    TS = _row_tile(S)
    nT = S // TS
    cost = pl.CostEstimate(flops=2 * B * S * H * O, transcendentals=0,
                           bytes_accessed=2 * (B * S * (H + O) + H * O) + 4 * O)
    return pl.pallas_call(
        qkv_kernel,
        out_shape=jax.ShapeDtypeStruct((B, S, O), jnp.bfloat16),
        grid=(B, nT),
        in_specs=[pl.BlockSpec((pl.Squeezed(), TS, H), lambda i, t: (i, t, 0)),
                  pl.BlockSpec((H, O), lambda i, t: (0, 0)),
                  pl.BlockSpec((1, O), lambda i, t: (0, 0))],
        out_specs=pl.BlockSpec((pl.Squeezed(), TS, O), lambda i, t: (i, t, 0)),
        compiler_params=_cparams(("parallel", "parallel")),
        cost_estimate=cost,
    )(x, w, b)


def attention(q, k, v, mask_bias):
    # q/k/v: (B, nH, S, hd) bf16; mask_bias: (B, 1, S) f32
    B, nH, S, hd = q.shape
    TQ = 128 if (S % 128 == 0) else S
    nQT = S // TQ
    scale = 1.0 / math.sqrt(hd)
    kern = functools.partial(attn_kernel, scale=scale)
    cost = pl.CostEstimate(flops=4 * B * nH * S * S * hd,
                           transcendentals=B * nH * S * S,
                           bytes_accessed=8 * B * nH * S * hd + 4 * B * S)
    return pl.pallas_call(
        kern,
        out_shape=jax.ShapeDtypeStruct((B, nH, S, hd), jnp.bfloat16),
        grid=(B, nQT),
        in_specs=[pl.BlockSpec((pl.Squeezed(), nH, TQ, hd), lambda b, t: (b, 0, t, 0)),
                  pl.BlockSpec((pl.Squeezed(), nH, S, hd), lambda b, t: (b, 0, 0, 0)),
                  pl.BlockSpec((pl.Squeezed(), nH, S, hd), lambda b, t: (b, 0, 0, 0)),
                  pl.BlockSpec((pl.Squeezed(), 1, S), lambda b, t: (b, 0, 0))],
        out_specs=pl.BlockSpec((pl.Squeezed(), nH, TQ, hd), lambda b, t: (b, 0, t, 0)),
        compiler_params=_cparams(("parallel", "parallel")),
        cost_estimate=cost,
    )(q, k, v, mask_bias)


def post_attn_ffn(x, ctx, p):
    B, S, H = x.shape
    I = p["w1"].shape[1]
    TS = _row_tile(S)
    nT = S // TS
    flat = [p["wo"], p["bo"], p["ln1_g"], p["ln1_b"],
            p["w1"], p["b1"], p["w2"], p["b2"], p["ln2_g"], p["ln2_b"]]
    cost = pl.CostEstimate(flops=2 * B * S * H * (H + 2 * I),
                           transcendentals=B * S * I,
                           bytes_accessed=2 * (3 * B * S * H + H * H + 2 * H * I))
    in_specs = ([pl.BlockSpec((pl.Squeezed(), TS, H), lambda b, t: (b, t, 0)),
                 pl.BlockSpec((pl.Squeezed(), TS, H), lambda b, t: (b, t, 0))]
                + [pl.BlockSpec(a.shape, lambda b, t: (0, 0)) for a in flat])
    return pl.pallas_call(
        post_attn_ffn_kernel,
        out_shape=jax.ShapeDtypeStruct((B, S, H), jnp.bfloat16),
        grid=(B, nT),
        in_specs=in_specs,
        out_specs=pl.BlockSpec((pl.Squeezed(), TS, H), lambda b, t: (b, t, 0)),
        compiler_params=_cparams(("parallel", "parallel")),
        cost_estimate=cost,
    )(x, ctx, *flat)


def pooler_classifier(cls_tok, wp, bp, wc, bc):
    B, H = cls_tok.shape
    C = wc.shape[1]
    return pl.pallas_call(
        head_kernel,
        out_shape=jax.ShapeDtypeStruct((B, C), jnp.float32),
        in_specs=[pl.BlockSpec((B, H), lambda: (0, 0)),
                  pl.BlockSpec((H, H), lambda: (0, 0)),
                  pl.BlockSpec((1, H), lambda: (0, 0)),
                  pl.BlockSpec((H, C), lambda: (0, 0)),
                  pl.BlockSpec((1, C), lambda: (0, 0))],
        out_specs=pl.BlockSpec((B, C), lambda: (0, 0)),
        compiler_params=pltpu.CompilerParams(vmem_limit_bytes=VMEM_LIMIT),
    )(cls_tok, wp, bp, wc, bc)


def bert_class_forward(params, input_ids, attention_mask, token_type_ids,
                       *, num_heads):
    B, S = input_ids.shape
    H = params["word_emb"].shape[1]
    head_dim = H // num_heads

    # embeddings: gathers + sum are glue in plain XLA; LayerNorm in Pallas.
    x = (params["word_emb"][input_ids]
         + params["pos_emb"][jnp.arange(S)][None, :, :]
         + params["type_emb"][token_type_ids])
    x = emb_layernorm(x, params["emb_ln_g"], params["emb_ln_b"])   # (B,S,H) bf16
    # TODO(synk): fuse emb LayerNorm into the first layer's QKV kernel to save
    # one activation HBM round-trip.

    # additive attention bias (B,1,S) f32: 0 where attended, -1e9 where padded
    mask_bias = ((1.0 - attention_mask.astype(jnp.float32)) * NEG_INF)[:, None, :]

    def to_heads(t):
        return t.reshape(B, S, num_heads, head_dim).transpose(0, 2, 1, 3)

    for p in params["layers"]:
        qkv = qkv_proj(x, p["wqkv"], p["bqkv"])                    # (B,S,3H) bf16
        q, k, v = jnp.split(qkv, 3, axis=-1)
        ctx = attention(to_heads(q), to_heads(k), to_heads(v), mask_bias)
        ctx = ctx.transpose(0, 2, 1, 3).reshape(B, S, H)           # (B,S,H) bf16
        x = post_attn_ffn(x, ctx, p)
    # TODO(synk): cross-pallas_call weight prefetch (P10) to hide layer i+1
    # weight DMA behind layer i compute.

    cls_tok = x[:, 0, :]                                           # [CLS] token
    logits = pooler_classifier(cls_tok, params["pool_w"], params["pool_b"],
                               params["cls_w"], params["cls_b"])
    return logits


# ------------------------------ parameter init --------------------------------
def init_params(key, *, vocab, max_pos, type_vocab, hidden, intermediate,
                num_layers, num_class):
    keys = iter(jax.random.split(key, 16 + 4 * num_layers))
    nrm_f32 = lambda shp: jax.random.normal(next(keys), shp, jnp.float32) * 0.02
    nrm_bf16 = lambda shp: (jax.random.normal(next(keys), shp, jnp.float32)
                            * 0.02).astype(jnp.bfloat16)
    zeros = lambda d: jnp.zeros((1, d), jnp.float32)
    ones = lambda d: jnp.ones((1, d), jnp.float32)

    params = {
        "word_emb": nrm_f32((vocab, hidden)),
        "pos_emb": nrm_f32((max_pos, hidden)),
        "type_emb": nrm_f32((type_vocab, hidden)),
        "emb_ln_g": ones(hidden),
        "emb_ln_b": zeros(hidden),
        "layers": [],
        "pool_w": nrm_bf16((hidden, hidden)),
        "pool_b": zeros(hidden),
        "cls_w": nrm_bf16((hidden, num_class)),
        "cls_b": zeros(num_class),
    }
    for _ in range(num_layers):
        params["layers"].append({
            # fused QKV projection weight (H, 3H), bf16 for the MXU
            "wqkv": nrm_bf16((hidden, 3 * hidden)), "bqkv": zeros(3 * hidden),
            "wo": nrm_bf16((hidden, hidden)), "bo": zeros(hidden),
            "ln1_g": ones(hidden), "ln1_b": zeros(hidden),
            "w1": nrm_bf16((hidden, intermediate)), "b1": zeros(intermediate),
            "w2": nrm_bf16((intermediate, hidden)), "b2": zeros(hidden),
            "ln2_g": ones(hidden), "ln2_b": zeros(hidden),
        })
    return params


# ----------------------------------- main -------------------------------------
if __name__ == "__main__":
    # small synthetic BERT config
    B, S = 2, 8
    VOCAB, MAX_POS, TYPE_VOCAB = 100, 16, 2
    HIDDEN, INTERMEDIATE = 32, 64
    NUM_LAYERS, NUM_HEADS = 2, 2
    labels = [0, 1, 2, 1, 0]
    NUM_CLASS = len(set(labels))

    key = jax.random.PRNGKey(0)
    pkey, ikey = jax.random.split(key)
    params = init_params(pkey, vocab=VOCAB, max_pos=MAX_POS,
                         type_vocab=TYPE_VOCAB, hidden=HIDDEN,
                         intermediate=INTERMEDIATE, num_layers=NUM_LAYERS,
                         num_class=NUM_CLASS)

    input_ids = jax.random.randint(ikey, (B, S), 0, VOCAB, dtype=jnp.int32)
    attention_mask = jnp.array([[1, 1, 1, 1, 1, 1, 1, 1],
                                [1, 1, 1, 1, 1, 1, 0, 0]], dtype=jnp.int32)
    token_type_ids = jnp.array([[0, 0, 0, 0, 1, 1, 1, 1],
                                [0, 0, 0, 1, 1, 1, 1, 1]], dtype=jnp.int32)

    fwd = jax.jit(functools.partial(bert_class_forward, num_heads=NUM_HEADS))
    logits = jax.block_until_ready(fwd(params, input_ids, attention_mask,
                                       token_type_ids))

    assert logits.shape == (B, NUM_CLASS), logits.shape
    assert logits.dtype == jnp.float32
    assert bool(jnp.all(jnp.isfinite(logits)))
    print("KERNEL_OK")
</pallas_src>

<mosaic_0001>
module attributes {stable_mosaic.version = 11 : i64} {
  func.func @attn_kernel(%arg0: i32, %arg1: i32, %arg2: memref<1x2x8x16xbf16, #tpu.memory_space<vmem>>, %arg3: memref<1x2x8x16xbf16, #tpu.memory_space<vmem>>, %arg4: memref<1x2x8x16xbf16, #tpu.memory_space<vmem>>, %arg5: memref<1x1x8xf32, #tpu.memory_space<vmem>>, %arg6: memref<1x2x8x16xbf16, #tpu.memory_space<vmem>>) attributes {dimension_semantics = [#tpu.dimension_semantics<parallel>, #tpu.dimension_semantics<parallel>], iteration_bounds = array<i64: 2, 1>, scalar_prefetch = 0 : i64, scratch_operands = 0 : i64, tpu.core_type = #tpu.core_type<tc>, window_params = [{transform_indices = @transform_0, window_bounds = array<i64: 1, 2, 8, 16>}, {transform_indices = @transform_1, window_bounds = array<i64: 1, 2, 8, 16>}, {transform_indices = @transform_2, window_bounds = array<i64: 1, 2, 8, 16>}, {transform_indices = @transform_3, window_bounds = array<i64: 1, 1, 8>}, {transform_indices = @transform_4, window_bounds = array<i64: 1, 2, 8, 16>}]} {
    %c0 = arith.constant 0 : index
    %c0_0 = arith.constant 0 : index
    %c0_1 = arith.constant 0 : index
    %c0_2 = arith.constant 0 : index
    %0 = vector.load %arg2[%c0, %c0_0, %c0_1, %c0_2] : memref<1x2x8x16xbf16, #tpu.memory_space<vmem>>, vector<1x2x8x16xbf16>
    %1 = vector.shape_cast %0 : vector<1x2x8x16xbf16> to vector<2x8x16xbf16>
    %c0_3 = arith.constant 0 : index
    %c0_4 = arith.constant 0 : index
    %c0_5 = arith.constant 0 : index
    %c0_6 = arith.constant 0 : index
    %2 = vector.load %arg3[%c0_3, %c0_4, %c0_5, %c0_6] : memref<1x2x8x16xbf16, #tpu.memory_space<vmem>>, vector<1x2x8x16xbf16>
    %3 = vector.shape_cast %2 : vector<1x2x8x16xbf16> to vector<2x8x16xbf16>
    %c0_7 = arith.constant 0 : index
    %c0_8 = arith.constant 0 : index
    %c0_9 = arith.constant 0 : index
    %c0_10 = arith.constant 0 : index
    %4 = vector.load %arg4[%c0_7, %c0_8, %c0_9, %c0_10] : memref<1x2x8x16xbf16, #tpu.memory_space<vmem>>, vector<1x2x8x16xbf16>
    %5 = vector.shape_cast %4 : vector<1x2x8x16xbf16> to vector<2x8x16xbf16>
    "tpu.trace_start"() <{level = 10 : i32, message = "hqd,hkd->hqk"}> : () -> ()
    %cst = arith.constant dense<0.000000e+00> : vector<2x8x8xf32>
    %6 = tpu.matmul %1, %3, %cst {dimension_numbers = #tpu.dot_dimension_numbers<[2], [2], [1], [1], [0, 0, 0, 1, 1, 1], [0], [0]>} : vector<2x8x16xbf16>, vector<2x8x16xbf16>, vector<2x8x8xf32> -> vector<2x8x8xf32>
    "tpu.trace_stop"() : () -> ()
    %cst_11 = arith.constant 2.500000e-01 : f32
    %7 = vector.broadcast %cst_11 : f32 to vector<2x8x8xf32>
    %8 = arith.mulf %6, %7 : vector<2x8x8xf32>
    %c0_12 = arith.constant 0 : index
    %c0_13 = arith.constant 0 : index
    %c0_14 = arith.constant 0 : index
    %9 = vector.load %arg5[%c0_12, %c0_13, %c0_14] : memref<1x1x8xf32, #tpu.memory_space<vmem>>, vector<1x1x8xf32>
    %10 = vector.shape_cast %9 : vector<1x1x8xf32> to vector<1x8xf32>
    %11 = vector.shape_cast %10 : vector<1x8xf32> to vector<1x1x8xf32>
    %12 = vector.broadcast %11 : vector<1x1x8xf32> to vector<2x8x8xf32>
    %13 = arith.addf %8, %12 : vector<2x8x8xf32>
    %cst_15 = arith.constant dense<0xFF800000> : vector<2x8xf32>
    %14 = vector.multi_reduction <maximumf>, %13, %cst_15 [2] : vector<2x8x8xf32> to vector<2x8xf32>
    %15 = vector.shape_cast %14 : vector<2x8xf32> to vector<2x8x1xf32>
    %16 = vector.broadcast %15 : vector<2x8x1xf32> to vector<2x8x8xf32>
    %17 = arith.subf %13, %16 : vector<2x8x8xf32>
    %18 = math.exp %17 : vector<2x8x8xf32>
    %cst_16 = arith.constant dense<0.000000e+00> : vector<2x8xf32>
    %19 = vector.multi_reduction <add>, %18, %cst_16 [2] : vector<2x8x8xf32> to vector<2x8xf32>
    %20 = vector.shape_cast %19 : vector<2x8xf32> to vector<2x8x1xf32>
    %21 = tpu.reciprocal %20 {approx = true} : vector<2x8x1xf32> -> vector<2x8x1xf32>
    %22 = vector.broadcast %21 : vector<2x8x1xf32> to vector<2x8x8xf32>
    %23 = arith.mulf %18, %22 : vector<2x8x8xf32>
    %24 = arith.truncf %23 : vector<2x8x8xf32> to vector<2x8x8xbf16>
    "tpu.trace_start"() <{level = 10 : i32, message = "hqk,hkd->hqd"}> : () -> ()
    %cst_17 = arith.constant dense<0.000000e+00> : vector<2x8x16xf32>
    %25 = tpu.matmul %24, %5, %cst_17 {dimension_numbers = #tpu.dot_dimension_numbers<[2], [1], [1], [2], [0, 0, 0, 1, 1, 2], [0], [0]>} : vector<2x8x8xbf16>, vector<2x8x16xbf16>, vector<2x8x16xf32> -> vector<2x8x16xf32>
    "tpu.trace_stop"() : () -> ()
    %26 = arith.truncf %25 : vector<2x8x16xf32> to vector<2x8x16xbf16>
    %c0_18 = arith.constant 0 : index
    %c0_19 = arith.constant 0 : index
    %c0_20 = arith.constant 0 : index
    %c0_21 = arith.constant 0 : index
    %27 = vector.load %arg6[%c0_18, %c0_19, %c0_20, %c0_21] : memref<1x2x8x16xbf16, #tpu.memory_space<vmem>>, vector<1x2x8x16xbf16>
    %28 = vector.shape_cast %27 : vector<1x2x8x16xbf16> to vector<2x8x16xbf16>
    %29 = vector.shape_cast %26 : vector<2x8x16xbf16> to vector<1x2x8x16xbf16>
    tpu.vector_store %arg6[%c0_18, %c0_19, %c0_20, %c0_21], %29 {strides = array<i32>} : memref<1x2x8x16xbf16, #tpu.memory_space<vmem>>, vector<1x2x8x16xbf16>,
    return
  }
  func.func @transform_0(%arg0: i32, %arg1: i32) -> (i32, i32, i32, i32) {
    %c0_i32 = arith.constant 0 : i32
    %c0_i32_0 = arith.constant 0 : i32
    %c0_i32_1 = arith.constant 0 : i32
    return %arg0, %c0_i32, %arg1, %c0_i32_0 : i32, i32, i32, i32
  }
  func.func @transform_1(%arg0: i32, %arg1: i32) -> (i32, i32, i32, i32) {
    %c0_i32 = arith.constant 0 : i32
    %c0_i32_0 = arith.constant 0 : i32
    %c0_i32_1 = arith.constant 0 : i32
    %c0_i32_2 = arith.constant 0 : i32
    return %arg0, %c0_i32, %c0_i32_0, %c0_i32_1 : i32, i32, i32, i32
  }
  func.func @transform_2(%arg0: i32, %arg1: i32) -> (i32, i32, i32, i32) {
    %c0_i32 = arith.constant 0 : i32
    %c0_i32_0 = arith.constant 0 : i32
    %c0_i32_1 = arith.constant 0 : i32
    %c0_i32_2 = arith.constant 0 : i32
    return %arg0, %c0_i32, %c0_i32_0, %c0_i32_1 : i32, i32, i32, i32
  }
  func.func @transform_3(%arg0: i32, %arg1: i32) -> (i32, i32, i32) {
    %c0_i32 = arith.constant 0 : i32
    %c0_i32_0 = arith.constant 0 : i32
    %c0_i32_1 = arith.constant 0 : i32
    return %arg0, %c0_i32, %c0_i32_0 : i32, i32, i32
  }
  func.func @transform_4(%arg0: i32, %arg1: i32) -> (i32, i32, i32, i32) {
    %c0_i32 = arith.constant 0 : i32
    %c0_i32_0 = arith.constant 0 : i32
    %c0_i32_1 = arith.constant 0 : i32
    return %arg0, %c0_i32, %arg1, %c0_i32_0 : i32, i32, i32, i32
  }
}

module attributes {stable_mosaic.version = 11 : i64} {
  func.func @qkv_kernel(%arg0: i32, %arg1: i32, %arg2: memref<1x8x32xbf16, #tpu.memory_space<vmem>>, %arg3: memref<32x96xbf16, #tpu.memory_space<vmem>>, %arg4: memref<1x96xf32, #tpu.memory_space<vmem>>, %arg5: memref<1x8x96xbf16, #tpu.memory_space<vmem>>) attributes {dimension_semantics = [#tpu.dimension_semantics<parallel>, #tpu.dimension_semantics<parallel>], iteration_bounds = array<i64: 2, 1>, scalar_prefetch = 0 : i64, scratch_operands = 0 : i64, tpu.core_type = #tpu.core_type<tc>, window_params = [{transform_indices = @transform_0, window_bounds = array<i64: 1, 8, 32>}, {pipeline_mode = #tpu.pipeline_mode<synchronous>, transform_indices = @transform_1, window_bounds = array<i64: 32, 96>}, {pipeline_mode = #tpu.pipeline_mode<synchronous>, transform_indices = @transform_2, window_bounds = array<i64: 1, 96>}, {transform_indices = @transform_3, window_bounds = array<i64: 1, 8, 96>}]} {
    %c0 = arith.constant 0 : index
    %c0_0 = arith.constant 0 : index
    %c0_1 = arith.constant 0 : index
    %0 = vector.load %arg2[%c0, %c0_0, %c0_1] : memref<1x8x32xbf16, #tpu.memory_space<vmem>>, vector<1x8x32xbf16>
    %1 = vector.shape_cast %0 : vector<1x8x32xbf16> to vector<8x32xbf16>
    %c0_2 = arith.constant 0 : index
    %c0_3 = arith.constant 0 : index
    %2 = vector.load %arg3[%c0_2, %c0_3] : memref<32x96xbf16, #tpu.memory_space<vmem>>, vector<32x96xbf16>
    %cst = arith.constant dense<0.000000e+00> : vector<8x96xf32>
    %3 = tpu.matmul %1, %2, %cst {dimension_numbers = #tpu.dot_dimension_numbers<[1], [0], [0], [1], [0, 0, 1, 1], [], []>} : vector<8x32xbf16>, vector<32x96xbf16>, vector<8x96xf32> -> vector<8x96xf32>
    %c0_4 = arith.constant 0 : index
    %c0_5 = arith.constant 0 : index
    %4 = vector.load %arg4[%c0_4, %c0_5] : memref<1x96xf32, #tpu.memory_space<vmem>>, vector<1x96xf32>
    %5 = vector.broadcast %4 : vector<1x96xf32> to vector<8x96xf32>
    %6 = arith.addf %3, %5 : vector<8x96xf32>
    %7 = arith.truncf %6 : vector<8x96xf32> to vector<8x96xbf16>
    %c0_6 = arith.constant 0 : index
    %c0_7 = arith.constant 0 : index
    %c0_8 = arith.constant 0 : index
    %8 = vector.load %arg5[%c0_6, %c0_7, %c0_8] : memref<1x8x96xbf16, #tpu.memory_space<vmem>>, vector<1x8x96xbf16>
    %9 = vector.shape_cast %8 : vector<1x8x96xbf16> to vector<8x96xbf16>
    %10 = vector.shape_cast %7 : vector<8x96xbf16> to vector<1x8x96xbf16>
    tpu.vector_store %arg5[%c0_6, %c0_7, %c0_8], %10 {strides = array<i32>} : memref<1x8x96xbf16, #tpu.memory_space<vmem>>, vector<1x8x96xbf16>,
    return
  }
  func.func @transform_0(%arg0: i32, %arg1: i32) -> (i32, i32, i32) {
    %c0_i32 = arith.constant 0 : i32
    %c0_i32_0 = arith.constant 0 : i32
    return %arg0, %arg1, %c0_i32 : i32, i32, i32
  }
  func.func @transform_1(%arg0: i32, %arg1: i32) -> (i32, i32) {
    %c0_i32 = arith.constant 0 : i32
    %c0_i32_0 = arith.constant 0 : i32
    %c0_i32_1 = arith.constant 0 : i32
    return %c0_i32, %c0_i32_0 : i32, i32
  }
  func.func @transform_2(%arg0: i32, %arg1: i32) -> (i32, i32) {
    %c0_i32 = arith.constant 0 : i32
    %c0_i32_0 = arith.constant 0 : i32
    %c0_i32_1 = arith.constant 0 : i32
    return %c0_i32, %c0_i32_0 : i32, i32
  }
  func.func @transform_3(%arg0: i32, %arg1: i32) -> (i32, i32, i32) {
    %c0_i32 = arith.constant 0 : i32
    %c0_i32_0 = arith.constant 0 : i32
    return %arg0, %arg1, %c0_i32 : i32, i32, i32
  }
}

module attributes {stable_mosaic.version = 11 : i64} {
  func.func @emb_ln_kernel(%arg0: i32, %arg1: i32, %arg2: memref<1x8x32xf32, #tpu.memory_space<vmem>>, %arg3: memref<1x32xf32, #tpu.memory_space<vmem>>, %arg4: memref<1x32xf32, #tpu.memory_space<vmem>>, %arg5: memref<1x8x32xbf16, #tpu.memory_space<vmem>>) attributes {dimension_semantics = [#tpu.dimension_semantics<parallel>, #tpu.dimension_semantics<parallel>], iteration_bounds = array<i64: 2, 1>, scalar_prefetch = 0 : i64, scratch_operands = 0 : i64, tpu.core_type = #tpu.core_type<tc>, window_params = [{transform_indices = @transform_0, window_bounds = array<i64: 1, 8, 32>}, {pipeline_mode = #tpu.pipeline_mode<synchronous>, transform_indices = @transform_1, window_bounds = array<i64: 1, 32>}, {pipeline_mode = #tpu.pipeline_mode<synchronous>, transform_indices = @transform_2, window_bounds = array<i64: 1, 32>}, {transform_indices = @transform_3, window_bounds = array<i64: 1, 8, 32>}]} {
    %c0 = arith.constant 0 : index
    %c0_0 = arith.constant 0 : index
    %c0_1 = arith.constant 0 : index
    %0 = vector.load %arg2[%c0, %c0_0, %c0_1] : memref<1x8x32xf32, #tpu.memory_space<vmem>>, vector<1x8x32xf32>
    %1 = vector.shape_cast %0 : vector<1x8x32xf32> to vector<8x32xf32>
    %c0_2 = arith.constant 0 : index
    %c0_3 = arith.constant 0 : index
    %2 = vector.load %arg3[%c0_2, %c0_3] : memref<1x32xf32, #tpu.memory_space<vmem>>, vector<1x32xf32>
    %c0_4 = arith.constant 0 : index
    %c0_5 = arith.constant 0 : index
    %3 = vector.load %arg4[%c0_4, %c0_5] : memref<1x32xf32, #tpu.memory_space<vmem>>, vector<1x32xf32>
    %cst = arith.constant dense<0.000000e+00> : vector<8xf32>
    %4 = vector.multi_reduction <add>, %1, %cst [1] : vector<8x32xf32> to vector<8xf32>
    %5 = vector.shape_cast %4 : vector<8xf32> to vector<8x1xf32>
    %cst_6 = arith.constant 3.200000e+01 : f32
    %6 = vector.broadcast %cst_6 : f32 to vector<8x1xf32>
    %7 = arith.divf %5, %6 : vector<8x1xf32>
    %8 = vector.broadcast %7 : vector<8x1xf32> to vector<8x32xf32>
    %9 = arith.subf %1, %8 : vector<8x32xf32>
    %10 = arith.mulf %9, %9 : vector<8x32xf32>
    %cst_7 = arith.constant dense<0.000000e+00> : vector<8xf32>
    %11 = vector.multi_reduction <add>, %10, %cst_7 [1] : vector<8x32xf32> to vector<8xf32>
    %12 = vector.shape_cast %11 : vector<8xf32> to vector<8x1xf32>
    %cst_8 = arith.constant 3.200000e+01 : f32
    %13 = vector.broadcast %cst_8 : f32 to vector<8x1xf32>
    %14 = arith.divf %12, %13 : vector<8x1xf32>
    %15 = vector.broadcast %7 : vector<8x1xf32> to vector<8x32xf32>
    %16 = arith.subf %1, %15 : vector<8x32xf32>
    %cst_9 = arith.constant 9.99999996E-13 : f32
    %17 = vector.broadcast %cst_9 : f32 to vector<8x1xf32>
    %18 = arith.addf %14, %17 : vector<8x1xf32>
    %19 = math.rsqrt %18 : vector<8x1xf32>
    %20 = vector.broadcast %19 : vector<8x1xf32> to vector<8x32xf32>
    %21 = arith.mulf %16, %20 : vector<8x32xf32>
    %22 = vector.broadcast %2 : vector<1x32xf32> to vector<8x32xf32>
    %23 = arith.mulf %21, %22 : vector<8x32xf32>
    %24 = vector.broadcast %3 : vector<1x32xf32> to vector<8x32xf32>
    %25 = arith.addf %23, %24 : vector<8x32xf32>
    %26 = arith.truncf %25 : vector<8x32xf32> to vector<8x32xbf16>
    %c0_10 = arith.constant 0 : index
    %c0_11 = arith.constant 0 : index
    %c0_12 = arith.constant 0 : index
    %27 = vector.load %arg5[%c0_10, %c0_11, %c0_12] : memref<1x8x32xbf16, #tpu.memory_space<vmem>>, vector<1x8x32xbf16>
    %28 = vector.shape_cast %27 : vector<1x8x32xbf16> to vector<8x32xbf16>
    %29 = vector.shape_cast %26 : vector<8x32xbf16> to vector<1x8x32xbf16>
    tpu.vector_store %arg5[%c0_10, %c0_11, %c0_12], %29 {strides = array<i32>} : memref<1x8x32xbf16, #tpu.memory_space<vmem>>, vector<1x8x32xbf16>,
    return
  }
  func.func @transform_0(%arg0: i32, %arg1: i32) -> (i32, i32, i32) {
    %c0_i32 = arith.constant 0 : i32
    %c0_i32_0 = arith.constant 0 : i32
    return %arg0, %arg1, %c0_i32 : i32, i32, i32
  }
  func.func @transform_1(%arg0: i32, %arg1: i32) -> (i32, i32) {
    %c0_i32 = arith.constant 0 : i32
    %c0_i32_0 = arith.constant 0 : i32
    %c0_i32_1 = arith.constant 0 : i32
    return %c0_i32, %c0_i32_0 : i32, i32
  }
  func.func @transform_2(%arg0: i32, %arg1: i32) -> (i32, i32) {
    %c0_i32 = arith.constant 0 : i32
    %c0_i32_0 = arith.constant 0 : i32
    %c0_i32_1 = arith.constant 0 : i32
    return %c0_i32, %c0_i32_0 : i32, i32
  }
  func.func @transform_3(%arg0: i32, %arg1: i32) -> (i32, i32, i32) {
    %c0_i32 = arith.constant 0 : i32
    %c0_i32_0 = arith.constant 0 : i32
    return %arg0, %arg1, %c0_i32 : i32, i32, i32
  }
}

module attributes {stable_mosaic.version = 11 : i64} {
  func.func @post_attn_ffn_kernel(%arg0: i32, %arg1: i32, %arg2: memref<1x8x32xbf16, #tpu.memory_space<vmem>>, %arg3: memref<1x8x32xbf16, #tpu.memory_space<vmem>>, %arg4: memref<32x32xbf16, #tpu.memory_space<vmem>>, %arg5: memref<1x32xf32, #tpu.memory_space<vmem>>, %arg6: memref<1x32xf32, #tpu.memory_space<vmem>>, %arg7: memref<1x32xf32, #tpu.memory_space<vmem>>, %arg8: memref<32x64xbf16, #tpu.memory_space<vmem>>, %arg9: memref<1x64xf32, #tpu.memory_space<vmem>>, %arg10: memref<64x32xbf16, #tpu.memory_space<vmem>>, %arg11: memref<1x32xf32, #tpu.memory_space<vmem>>, %arg12: memref<1x32xf32, #tpu.memory_space<vmem>>, %arg13: memref<1x32xf32, #tpu.memory_space<vmem>>, %arg14: memref<1x8x32xbf16, #tpu.memory_space<vmem>>) attributes {dimension_semantics = [#tpu.dimension_semantics<parallel>, #tpu.dimension_semantics<parallel>], iteration_bounds = array<i64: 2, 1>, scalar_prefetch = 0 : i64, scratch_operands = 0 : i64, tpu.core_type = #tpu.core_type<tc>, window_params = [{transform_indices = @transform_0, window_bounds = array<i64: 1, 8, 32>}, {transform_indices = @transform_1, window_bounds = array<i64: 1, 8, 32>}, {pipeline_mode = #tpu.pipeline_mode<synchronous>, transform_indices = @transform_2, window_bounds = array<i64: 32, 32>}, {pipeline_mode = #tpu.pipeline_mode<synchronous>, transform_indices = @transform_3, window_bounds = array<i64: 1, 32>}, {pipeline_mode = #tpu.pipeline_mode<synchronous>, transform_indices = @transform_4, window_bounds = array<i64: 1, 32>}, {pipeline_mode = #tpu.pipeline_mode<synchronous>, transform_indices = @transform_5, window_bounds = array<i64: 1, 32>}, {pipeline_mode = #tpu.pipeline_mode<synchronous>, transform_indices = @transform_6, window_bounds = array<i64: 32, 64>}, {pipeline_mode = #tpu.pipeline_mode<synchronous>, transform_indices = @transform_7, window_bounds = array<i64: 1, 64>}, {pipeline_mode = #tpu.pipeline_mode<synchronous>, transform_indices = @transform_8, window_bounds = array<i64: 64, 32>}, {pipeline_mode = #tpu.pipeline_mode<synchronous>, transform_indices = @transform_9, window_bounds = array<i64: 1, 32>}, {pipeline_mode = #tpu.pipeline_mode<synchronous>, transform_indices = @transform_10, window_bounds = array<i64: 1, 32>}, {pipeline_mode = #tpu.pipeline_mode<synchronous>, transform_indices = @transform_11, window_bounds = array<i64: 1, 32>}, {transform_indices = @transform_12, window_bounds = array<i64: 1, 8, 32>}]} {
    %c0 = arith.constant 0 : index
    %c0_0 = arith.constant 0 : index
    %c0_1 = arith.constant 0 : index
    %0 = vector.load %arg3[%c0, %c0_0, %c0_1] : memref<1x8x32xbf16, #tpu.memory_space<vmem>>, vector<1x8x32xbf16>
    %1 = vector.shape_cast %0 : vector<1x8x32xbf16> to vector<8x32xbf16>
    %c0_2 = arith.constant 0 : index
    %c0_3 = arith.constant 0 : index
    %2 = vector.load %arg4[%c0_2, %c0_3] : memref<32x32xbf16, #tpu.memory_space<vmem>>, vector<32x32xbf16>
    %cst = arith.constant dense<0.000000e+00> : vector<8x32xf32>
    %3 = tpu.matmul %1, %2, %cst {dimension_numbers = #tpu.dot_dimension_numbers<[1], [0], [0], [1], [0, 0, 1, 1], [], []>} : vector<8x32xbf16>, vector<32x32xbf16>, vector<8x32xf32> -> vector<8x32xf32>
    %c0_4 = arith.constant 0 : index
    %c0_5 = arith.constant 0 : index
    %4 = vector.load %arg5[%c0_4, %c0_5] : memref<1x32xf32, #tpu.memory_space<vmem>>, vector<1x32xf32>
    %5 = vector.broadcast %4 : vector<1x32xf32> to vector<8x32xf32>
    %6 = arith.addf %3, %5 : vector<8x32xf32>
    %c0_6 = arith.constant 0 : index
    %c0_7 = arith.constant 0 : index
    %c0_8 = arith.constant 0 : index
    %7 = vector.load %arg2[%c0_6, %c0_7, %c0_8] : memref<1x8x32xbf16, #tpu.memory_space<vmem>>, vector<1x8x32xbf16>
    %8 = vector.shape_cast %7 : vector<1x8x32xbf16> to vector<8x32xbf16>
    %9 = arith.extf %8 : vector<8x32xbf16> to vector<8x32xf32>
    %10 = arith.addf %9, %6 : vector<8x32xf32>
    %c0_9 = arith.constant 0 : index
    %c0_10 = arith.constant 0 : index
    %11 = vector.load %arg6[%c0_9, %c0_10] : memref<1x32xf32, #tpu.memory_space<vmem>>, vector<1x32xf32>
    %c0_11 = arith.constant 0 : index
    %c0_12 = arith.constant 0 : index
    %12 = vector.load %arg7[%c0_11, %c0_12] : memref<1x32xf32, #tpu.memory_space<vmem>>, vector<1x32xf32>
    %cst_13 = arith.constant dense<0.000000e+00> : vector<8xf32>
    %13 = vector.multi_reduction <add>, %10, %cst_13 [1] : vector<8x32xf32> to vector<8xf32>
    %14 = vector.shape_cast %13 : vector<8xf32> to vector<8x1xf32>
    %cst_14 = arith.constant 3.200000e+01 : f32
    %15 = vector.broadcast %cst_14 : f32 to vector<8x1xf32>
    %16 = arith.divf %14, %15 : vector<8x1xf32>
    %17 = vector.broadcast %16 : vector<8x1xf32> to vector<8x32xf32>
    %18 = arith.subf %10, %17 : vector<8x32xf32>
    %19 = arith.mulf %18, %18 : vector<8x32xf32>
    %cst_15 = arith.constant dense<0.000000e+00> : vector<8xf32>
    %20 = vector.multi_reduction <add>, %19, %cst_15 [1] : vector<8x32xf32> to vector<8xf32>
    %21 = vector.shape_cast %20 : vector<8xf32> to vector<8x1xf32>
    %cst_16 = arith.constant 3.200000e+01 : f32
    %22 = vector.broadcast %cst_16 : f32 to vector<8x1xf32>
    %23 = arith.divf %21, %22 : vector<8x1xf32>
    %24 = vector.broadcast %16 : vector<8x1xf32> to vector<8x32xf32>
    %25 = arith.subf %10, %24 : vector<8x32xf32>
    %cst_17 = arith.constant 9.99999996E-13 : f32
    %26 = vector.broadcast %cst_17 : f32 to vector<8x1xf32>
    %27 = arith.addf %23, %26 : vector<8x1xf32>
    %28 = math.rsqrt %27 : vector<8x1xf32>
    %29 = vector.broadcast %28 : vector<8x1xf32> to vector<8x32xf32>
    %30 = arith.mulf %25, %29 : vector<8x32xf32>
    %31 = vector.broadcast %11 : vector<1x32xf32> to vector<8x32xf32>
    %32 = arith.mulf %30, %31 : vector<8x32xf32>
    %33 = vector.broadcast %12 : vector<1x32xf32> to vector<8x32xf32>
    %34 = arith.addf %32, %33 : vector<8x32xf32>
    %35 = arith.truncf %34 : vector<8x32xf32> to vector<8x32xbf16>
    %c0_18 = arith.constant 0 : index
    %c0_19 = arith.constant 0 : index
    %36 = vector.load %arg8[%c0_18, %c0_19] : memref<32x64xbf16, #tpu.memory_space<vmem>>, vector<32x64xbf16>
    %cst_20 = arith.constant dense<0.000000e+00> : vector<8x64xf32>
    %37 = tpu.matmul %35, %36, %cst_20 {dimension_numbers = #tpu.dot_dimension_numbers<[1], [0], [0], [1], [0, 0, 1, 1], [], []>} : vector<8x32xbf16>, vector<32x64xbf16>, vector<8x64xf32> -> vector<8x64xf32>
    %c0_21 = arith.constant 0 : index
    %c0_22 = arith.constant 0 : index
    %38 = vector.load %arg9[%c0_21, %c0_22] : memref<1x64xf32, #tpu.memory_space<vmem>>, vector<1x64xf32>
    %39 = vector.broadcast %38 : vector<1x64xf32> to vector<8x64xf32>
    %40 = arith.addf %37, %39 : vector<8x64xf32>
    %cst_23 = arith.constant 0.636619746 : f32
    %41 = math.sqrt %cst_23 : f32
    %cst_24 = arith.constant 5.000000e-01 : f32
    %42 = vector.broadcast %cst_24 : f32 to vector<8x64xf32>
    %43 = arith.mulf %42, %40 : vector<8x64xf32>
    %cst_25 = arith.constant 4.471500e-02 : f32
    %44 = vector.broadcast %cst_25 : f32 to vector<8x64xf32>
    %45 = arith.mulf %44, %40 : vector<8x64xf32>
    %46 = arith.mulf %45, %40 : vector<8x64xf32>
    %47 = arith.mulf %46, %40 : vector<8x64xf32>
    %48 = arith.addf %40, %47 : vector<8x64xf32>
    %49 = vector.broadcast %41 : f32 to vector<8x64xf32>
    %50 = arith.mulf %49, %48 : vector<8x64xf32>
    %51 = math.tanh %50 : vector<8x64xf32>
    %cst_26 = arith.constant 1.000000e+00 : f32
    %52 = vector.broadcast %cst_26 : f32 to vector<8x64xf32>
    %53 = arith.addf %52, %51 : vector<8x64xf32>
    %54 = arith.mulf %43, %53 : vector<8x64xf32>
    %55 = arith.truncf %54 : vector<8x64xf32> to vector<8x64xbf16>
    %c0_27 = arith.constant 0 : index
    %c0_28 = arith.constant 0 : index
    %56 = vector.load %arg10[%c0_27, %c0_28] : memref<64x32xbf16, #tpu.memory_space<vmem>>, vector<64x32xbf16>
    %cst_29 = arith.constant dense<0.000000e+00> : vector<8x32xf32>
    %57 = tpu.matmul %55, %56, %cst_29 {dimension_numbers = #tpu.dot_dimension_numbers<[1], [0], [0], [1], [0, 0, 1, 1], [], []>} : vector<8x64xbf16>, vector<64x32xbf16>, vector<8x32xf32> -> vector<8x32xf32>
    %c0_30 = arith.constant 0 : index
    %c0_31 = arith.constant 0 : index
    %58 = vector.load %arg11[%c0_30, %c0_31] : memref<1x32xf32, #tpu.memory_space<vmem>>, vector<1x32xf32>
    %59 = vector.broadcast %58 : vector<1x32xf32> to vector<8x32xf32>
    %60 = arith.addf %57, %59 : vector<8x32xf32>
    %61 = arith.addf %34, %60 : vector<8x32xf32>
    %c0_32 = arith.constant 0 : index
    %c0_33 = arith.constant 0 : index
    %62 = vector.load %arg12[%c0_32, %c0_33] : memref<1x32xf32, #tpu.memory_space<vmem>>, vector<1x32xf32>
    %c0_34 = arith.constant 0 : index
    %c0_35 = arith.constant 0 : index
    %63 = vector.load %arg13[%c0_34, %c0_35] : memref<1x32xf32, #tpu.memory_space<vmem>>, vector<1x32xf32>
    %cst_36 = arith.constant dense<0.000000e+00> : vector<8xf32>
    %64 = vector.multi_reduction <add>, %61, %cst_36 [1] : vector<8x32xf32> to vector<8xf32>
    %65 = vector.shape_cast %64 : vector<8xf32> to vector<8x1xf32>
    %cst_37 = arith.constant 3.200000e+01 : f32
    %66 = vector.broadcast %cst_37 : f32 to vector<8x1xf32>
    %67 = arith.divf %65, %66 : vector<8x1xf32>
    %68 = vector.broadcast %67 : vector<8x1xf32> to vector<8x32xf32>
    %69 = arith.subf %61, %68 : vector<8x32xf32>
    %70 = arith.mulf %69, %69 : vector<8x32xf32>
    %cst_38 = arith.constant dense<0.000000e+00> : vector<8xf32>
    %71 = vector.multi_reduction <add>, %70, %cst_38 [1] : vector<8x32xf32> to vector<8xf32>
    %72 = vector.shape_cast %71 : vector<8xf32> to vector<8x1xf32>
    %cst_39 = arith.constant 3.200000e+01 : f32
    %73 = vector.broadcast %cst_39 : f32 to vector<8x1xf32>
    %74 = arith.divf %72, %73 : vector<8x1xf32>
    %75 = vector.broadcast %67 : vector<8x1xf32> to vector<8x32xf32>
    %76 = arith.subf %61, %75 : vector<8x32xf32>
    %cst_40 = arith.constant 9.99999996E-13 : f32
    %77 = vector.broadcast %cst_40 : f32 to vector<8x1xf32>
    %78 = arith.addf %74, %77 : vector<8x1xf32>
    %79 = math.rsqrt %78 : vector<8x1xf32>
    %80 = vector.broadcast %79 : vector<8x1xf32> to vector<8x32xf32>
    %81 = arith.mulf %76, %80 : vector<8x32xf32>
    %82 = vector.broadcast %62 : vector<1x32xf32> to vector<8x32xf32>
    %83 = arith.mulf %81, %82 : vector<8x32xf32>
    %84 = vector.broadcast %63 : vector<1x32xf32> to vector<8x32xf32>
    %85 = arith.addf %83, %84 : vector<8x32xf32>
    %86 = arith.truncf %85 : vector<8x32xf32> to vector<8x32xbf16>
    %c0_41 = arith.constant 0 : index
    %c0_42 = arith.constant 0 : index
    %c0_43 = arith.constant 0 : index
    %87 = vector.load %arg14[%c0_41, %c0_42, %c0_43] : memref<1x8x32xbf16, #tpu.memory_space<vmem>>, vector<1x8x32xbf16>
    %88 = vector.shape_cast %87 : vector<1x8x32xbf16> to vector<8x32xbf16>
    %89 = vector.shape_cast %86 : vector<8x32xbf16> to vector<1x8x32xbf16>
    tpu.vector_store %arg14[%c0_41, %c0_42, %c0_43], %89 {strides = array<i32>} : memref<1x8x32xbf16, #tpu.memory_space<vmem>>, vector<1x8x32xbf16>,
    return
  }
  func.func @transform_0(%arg0: i32, %arg1: i32) -> (i32, i32, i32) {
    %c0_i32 = arith.constant 0 : i32
    %c0_i32_0 = arith.constant 0 : i32
    return %arg0, %arg1, %c0_i32 : i32, i32, i32
  }
  func.func @transform_1(%arg0: i32, %arg1: i32) -> (i32, i32, i32) {
    %c0_i32 = arith.constant 0 : i32
    %c0_i32_0 = arith.constant 0 : i32
    return %arg0, %arg1, %c0_i32 : i32, i32, i32
  }
  func.func @transform_2(%arg0: i32, %arg1: i32) -> (i32, i32) {
    %c0_i32 = arith.constant 0 : i32
    %c0_i32_0 = arith.constant 0 : i32
    %c0_i32_1 = arith.constant 0 : i32
    return %c0_i32, %c0_i32_0 : i32, i32
  }
  func.func @transform_3(%arg0: i32, %arg1: i32) -> (i32, i32) {
    %c0_i32 = arith.constant 0 : i32
    %c0_i32_0 = arith.constant 0 : i32
    %c0_i32_1 = arith.constant 0 : i32
    return %c0_i32, %c0_i32_0 : i32, i32
  }
  func.func @transform_4(%arg0: i32, %arg1: i32) -> (i32, i32) {
    %c0_i32 = arith.constant 0 : i32
    %c0_i32_0 = arith.constant 0 : i32
    %c0_i32_1 = arith.constant 0 : i32
    return %c0_i32, %c0_i32_0 : i32, i32
  }
  func.func @transform_5(%arg0: i32, %arg1: i32) -> (i32, i32) {
    %c0_i32 = arith.constant 0 : i32
    %c0_i32_0 = arith.constant 0 : i32
    %c0_i32_1 = arith.constant 0 : i32
    return %c0_i32, %c0_i32_0 : i32, i32
  }
  func.func @transform_6(%arg0: i32, %arg1: i32) -> (i32, i32) {
    %c0_i32 = arith.constant 0 : i32
    %c0_i32_0 = arith.constant 0 : i32
    %c0_i32_1 = arith.constant 0 : i32
    return %c0_i32, %c0_i32_0 : i32, i32
  }
  func.func @transform_7(%arg0: i32, %arg1: i32) -> (i32, i32) {
    %c0_i32 = arith.constant 0 : i32
    %c0_i32_0 = arith.constant 0 : i32
    %c0_i32_1 = arith.constant 0 : i32
    return %c0_i32, %c0_i32_0 : i32, i32
  }
  func.func @transform_8(%arg0: i32, %arg1: i32) -> (i32, i32) {
    %c0_i32 = arith.constant 0 : i32
    %c0_i32_0 = arith.constant 0 : i32
    %c0_i32_1 = arith.constant 0 : i32
    return %c0_i32, %c0_i32_0 : i32, i32
  }
  func.func @transform_9(%arg0: i32, %arg1: i32) -> (i32, i32) {
    %c0_i32 = arith.constant 0 : i32
    %c0_i32_0 = arith.constant 0 : i32
    %c0_i32_1 = arith.constant 0 : i32
    return %c0_i32, %c0_i32_0 : i32, i32
  }
  func.func @transform_10(%arg0: i32, %arg1: i32) -> (i32, i32) {
    %c0_i32 = arith.constant 0 : i32
    %c0_i32_0 = arith.constant 0 : i32
    %c0_i32_1 = arith.constant 0 : i32
    return %c0_i32, %c0_i32_0 : i32, i32
  }
  func.func @transform_11(%arg0: i32, %arg1: i32) -> (i32, i32) {
    %c0_i32 = arith.constant 0 : i32
    %c0_i32_0 = arith.constant 0 : i32
    %c0_i32_1 = arith.constant 0 : i32
    return %c0_i32, %c0_i32_0 : i32, i32
  }
  func.func @transform_12(%arg0: i32, %arg1: i32) -> (i32, i32, i32) {
    %c0_i32 = arith.constant 0 : i32
    %c0_i32_0 = arith.constant 0 : i32
    return %arg0, %arg1, %c0_i32 : i32, i32, i32
  }
}

module attributes {stable_mosaic.version = 11 : i64} {
  func.func @head_kernel(%arg0: memref<2x32xbf16, #tpu.memory_space<vmem>>, %arg1: memref<32x32xbf16, #tpu.memory_space<vmem>>, %arg2: memref<1x32xf32, #tpu.memory_space<vmem>>, %arg3: memref<32x3xbf16, #tpu.memory_space<vmem>>, %arg4: memref<1x3xf32, #tpu.memory_space<vmem>>, %arg5: memref<2x3xf32, #tpu.memory_space<vmem>>) attributes {dimension_semantics = [], scalar_prefetch = 0 : i64, scratch_operands = 0 : i64, tpu.core_type = #tpu.core_type<tc>} {
    %c0 = arith.constant 0 : index
    %c0_0 = arith.constant 0 : index
    %0 = vector.load %arg0[%c0, %c0_0] : memref<2x32xbf16, #tpu.memory_space<vmem>>, vector<2x32xbf16>
    %c0_1 = arith.constant 0 : index
    %c0_2 = arith.constant 0 : index
    %1 = vector.load %arg1[%c0_1, %c0_2] : memref<32x32xbf16, #tpu.memory_space<vmem>>, vector<32x32xbf16>
    %cst = arith.constant dense<0.000000e+00> : vector<2x32xf32>
    %2 = tpu.matmul %0, %1, %cst {dimension_numbers = #tpu.dot_dimension_numbers<[1], [0], [0], [1], [0, 0, 1, 1], [], []>} : vector<2x32xbf16>, vector<32x32xbf16>, vector<2x32xf32> -> vector<2x32xf32>
    %c0_3 = arith.constant 0 : index
    %c0_4 = arith.constant 0 : index
    %3 = vector.load %arg2[%c0_3, %c0_4] : memref<1x32xf32, #tpu.memory_space<vmem>>, vector<1x32xf32>
    %4 = vector.broadcast %3 : vector<1x32xf32> to vector<2x32xf32>
    %5 = arith.addf %2, %4 : vector<2x32xf32>
    %6 = math.tanh %5 : vector<2x32xf32>
    %7 = arith.truncf %6 : vector<2x32xf32> to vector<2x32xbf16>
    %c0_5 = arith.constant 0 : index
    %c0_6 = arith.constant 0 : index
    %8 = vector.load %arg3[%c0_5, %c0_6] : memref<32x3xbf16, #tpu.memory_space<vmem>>, vector<32x3xbf16>
    %cst_7 = arith.constant dense<0.000000e+00> : vector<2x3xf32>
    %9 = tpu.matmul %7, %8, %cst_7 {dimension_numbers = #tpu.dot_dimension_numbers<[1], [0], [0], [1], [0, 0, 1, 1], [], []>} : vector<2x32xbf16>, vector<32x3xbf16>, vector<2x3xf32> -> vector<2x3xf32>
    %c0_8 = arith.constant 0 : index
    %c0_9 = arith.constant 0 : index
    %10 = vector.load %arg4[%c0_8, %c0_9] : memref<1x3xf32, #tpu.memory_space<vmem>>, vector<1x3xf32>
    %11 = vector.broadcast %10 : vector<1x3xf32> to vector<2x3xf32>
    %12 = arith.addf %9, %11 : vector<2x3xf32>
    %c0_10 = arith.constant 0 : index
    %c0_11 = arith.constant 0 : index
    %13 = vector.load %arg5[%c0_10, %c0_11] : memref<2x3xf32, #tpu.memory_space<vmem>>, vector<2x3xf32>
    tpu.vector_store %arg5[%c0_10, %c0_11], %12 {strides = array<i32>} : memref<2x3xf32, #tpu.memory_space<vmem>>, vector<2x3xf32>,
    return
  }
}

</mosaic_0001>

<bundles_post_ra>
// kernel: bert_class_forward.9
= control target key start
LH: loop header
LB: loop body
LE: loop exit
PB: predicated region body
PF: predicated region fallthrough
CT: control target
= control target key end

     0   :  { %s441_s12 = smov 0   ;;  %s443_s13 = smov 0   ;;  %s483_s0 = inlined_call_operand.vmem [shape: bf16[2,8,32], index: 0, kind: input, shape index: {}]   ;;  %s484_s1 = inlined_call_operand.vmem [shape: bf16[32,96], index: 1, kind: input, shape index: {}]   ;;  %s485_s2 = inlined_call_operand.vmem [shape: f32[1,96], index: 2, kind: input, shape index: {}]   ;;  %s486_s3 = inlined_call_operand.vmem [shape: bf16[2,8,96], index: 3, kind: output, shape index: {}]  }
   0x1   :  { %s445_s14 = smov 0  }
   0x2 LB: > { %s25_s15 = sadd.s32 1, %s413_s13  ;;  %p347_p0 = scmp.ge.s32.totalorder %s417_s14, 1  ;;  %s417_s14 = sphi %s445_s14, %s13_s14   ;;  %s413_s13 = sphi %s443_s13, %s488_s13   ;;  %s409_s12 = sphi %s441_s12, %s487_s12  }
   0x3   : > { %p27_p1 = scmp.ge.s32.totalorder %s25_s15, 2  ;;  %p155_p2 = scmp.lt.s32.totalorder %s417_s14, 3 }
   0x5   : > { %s490_s15 = smov (%p27_p1, %s25_s15), 0  ;;  %p156_p3 = pnand %p347_p0, %p155_p2 }
   0x6   : > { %p183_p4 = scmp.lt.s32.totalorder (!%p156_p3), %s409_s12, 1 }
   0x7   : > { %159 = sbr.rel (%p156_p3) target bundleno = 220 (0xdc), region = 32 }
   0xc   : > { %v393_v0 = vld [vmem:[%s484_s1 + $0x8] sm:$0xff]   ;;  %v419_v1 = vmov 0.0   ;;  %v394_v2 = vld [vmem:[%s484_s1] sm:$0xff]   ;;  %vm420_vm0 = vmmov 0   ;;  %s492_s12 = smov (!%p183_p4, %s409_s12), 1  ;;  %vm222_vm1 = vcmask 261120  }
   0xd   : > { %359 = vmatprep.subr.bf16.mxu0 %v419_v1  ;;  %363 = vmatprep.mubr.msk.bf16.mxu0 %vm420_vm0, %v419_v1  ;;  %s348_s20 = sshll.u32 %s492_s12, 2  ;;  %v350_v4 = vld [vmem:[%s485_s2] ss:$0 sm:$0xff]  ;;  %vm267_vm2 = vcmask 781312  }
   0xe   : > { %360 = vmatpush3.bf16.msra.mxu0 %v393_v0  ;;  %s189_s23 = scalar_lea.vmem %s483_s0, %s348_s20  ;;  %s196_s28 = scalar_lea.vmem %s486_s3, %s348_s20 }
   0xf   : > { %361 = vmatprep.subr.bf16.mxu0 %v419_v1  ;;  %v198_v3 = vld [vmem:[%s189_s23] sm:$0xf] }
  0x12   : > { %362 = vmatpush3.bf16.msra.mxu0 %v394_v2 }
  0x15   : > { %364 = vmatmul.mubr.msk.bf16.vlgmr.msra.gmra.mxu0 %vm222_vm1, %v198_v3 }
  0xd5   : > { %v260_v5 = vpop.f32.mrf.mxu0 }
  0xd6   : > { %v261_v6 = vadd.f32 %v350_v4, %v260_v5 }
  0xd7   : > { %v365_v7 = vpop.f32.mrf.mxu0 }
  0xd8   : > { %v266_v8 = vpack.c.bf16 %v261_v6, %v261_v6 }
  0xd9   : > { %v263_v9 = vpop.f32.mrf.mxu0 }
  0xda   : > { %268 = vst.msk [vmem:[%s196_s28] sm:$0xf] %vm267_vm2, %v266_v8 }
  0xdb   : > { %v366_v10 = vpop.f32.mrf.mxu0 }
  0xdc PF: > { %s13_s14 = sadd.s32 1, %s417_s14   ;;  %s487_s12 = smov %s413_s13 }
  0xdd   : > { %p10_p5 = scmp.ge.s32.totalorder %s13_s14, 4   ;;  %s488_s13 = smov %s490_s15 }
  0xdf   :  { %12 = sbr.rel (!%p10_p5) target bundleno = 2 (0x2), region = 62 }

// kernel: bert_class_forward.8
= control target key start
LH: loop header
LB: loop body
LE: loop exit
PB: predicated region body
PF: predicated region fallthrough
CT: control target
= control target key end

     0   :  { %s387_s12 = smov 0   ;;  %s389_s13 = smov 0   ;;  %s426_s0 = inlined_call_operand.vmem [shape: f32[2,8,32], index: 0, kind: input, shape index: {}]   ;;  %s427_s1 = inlined_call_operand.vmem [shape: f32[1,32], index: 1, kind: input, shape index: {}]   ;;  %s428_s2 = inlined_call_operand.vmem [shape: f32[1,32], index: 2, kind: input, shape index: {}]   ;;  %s429_s3 = inlined_call_operand.vmem [shape: bf16[2,8,32], index: 3, kind: output, shape index: {}]  }
   0x1   :  { %s391_s14 = smov 0  }
   0x2 LB: > { %s25_s15 = sadd.s32 1, %s361_s13  ;;  %p310_p0 = scmp.ge.s32.totalorder %s365_s14, 1  ;;  %s365_s14 = sphi %s391_s14, %s13_s14   ;;  %s361_s13 = sphi %s389_s13, %s431_s13   ;;  %s357_s12 = sphi %s387_s12, %s430_s12  }
   0x3   : > { %p27_p1 = scmp.ge.s32.totalorder %s25_s15, 2  ;;  %p155_p2 = scmp.lt.s32.totalorder %s365_s14, 3 }
   0x5   : > { %s433_s15 = smov (%p27_p1, %s25_s15), 0  ;;  %p156_p3 = pnand %p310_p0, %p155_p2 }
   0x6   : > { %p183_p4 = scmp.lt.s32.totalorder (!%p156_p3), %s357_s12, 1 }
   0x7   : > { %159 = sbr.rel (%p156_p3) target bundleno = 327 (0x147), region = 32 }
   0xc   : > { %s435_s12 = smov (!%p183_p4, %s357_s12), 1  ;;  %vm200_vm0 = vcmask 261120   ;;  %v313_v11 = vld [vmem:[%s427_s1] ss:$0 sm:$0xff]  ;;  %vm230_vm1 = vcmask 257024  }
   0xd   : > { %s311_s16 = sshll.u32 %s435_s12, 3  ;;  %v314_v13 = vld [vmem:[%s428_s2] ss:$0 sm:$0xff]  ;;  %s312_s24 = sshll.u32 %s435_s12, 2 }
   0xe   : > { %s189_s19 = scalar_lea.vmem %s426_s0, %s311_s16  ;;  %s196_s27 = scalar_lea.vmem %s429_s3, %s312_s24 }
   0xf   : > { %v197_v0 = vld [vmem:[%s189_s19] sm:$0xff] }
  0x10   : > { %v201_v1 = vsel %vm200_vm0, %v197_v0, 0.0 }
  0x11   : > { %202 = vadd.xlane.f32.xlu0 %v201_v1 }
  0x9a   : > { %v203_v2 = vpop.xlane.xlu0 %202 }
  0x9b   : > { %v205_v3 = vmul.f32 0.03125, %v203_v2 }
  0x9d   : > { %v206_v4 = vsub.f32 %v197_v0, %v205_v3 }
  0x9f   : > { %v207_v5 = vmul.f32 %v206_v4, %v206_v4 }
  0xa1   : > { %v208_v6 = vsel %vm200_vm0, %v207_v5, 0.0 }
  0xa2   : > { %209 = vadd.xlane.f32.xlu0 %v208_v6 }
 0x12b   : > { %v210_v7 = vpop.xlane.xlu0 %209 }
 0x12c   : > { %v211_v8 = vmul.f32 0.03125, %v210_v7 }
 0x12e   : > { %v212_v9 = vadd.f32 1e-12, %v211_v8 }
 0x130   : > { %341 = vrsqrt.f32 %v212_v9 }
 0x13d   : > { %v342_v10 = vpop.eup %341 }
 0x13e   : > { %v214_v12 = vmul.f32 %v342_v10, %v206_v4 }
 0x140   : > { %v221_v14 = vmul.f32 %v313_v11, %v214_v12 }
 0x142   : > { %v228_v15 = vadd.f32 %v314_v13, %v221_v14 }
 0x144   : > { %v229_v16 = vpack.c.bf16 %v228_v15, %v228_v15 }
 0x146   : > { %231 = vst.msk [vmem:[%s196_s27] sm:$0xf] %vm230_vm1, %v229_v16 }
 0x147 PF: > { %s13_s14 = sadd.s32 1, %s365_s14   ;;  %s430_s12 = smov %s361_s13 }
 0x148   : > { %p10_p5 = scmp.ge.s32.totalorder %s13_s14, 4   ;;  %s431_s13 = smov %s433_s15 }
 0x14a   :  { %12 = sbr.rel (!%p10_p5) target bundleno = 2 (0x2), region = 62 }

// kernel: bert_class_forward.10
= control target key start
LH: loop header
LB: loop body
LE: loop exit
PB: predicated region body
PF: predicated region fallthrough
CT: control target
= control target key end

     0   :  { %s774_s15 = smov 0   ;;  %s776_s16 = smov 0   ;;  %s832_s0 = inlined_call_operand.vmem [shape: bf16[2,2,8,16], index: 0, kind: input, shape index: {}]   ;;  %s833_s1 = inlined_call_operand.vmem [shape: bf16[2,2,8,16], index: 1, kind: input, shape index: {}]   ;;  %s834_s2 = inlined_call_operand.vmem [shape: bf16[2,2,8,16], index: 2, kind: input, shape index: {}]   ;;  %s835_s3 = inlined_call_operand.vmem [shape: f32[2,1,8], index: 3, kind: input, shape index: {}]   ;;  %s836_s4 = inlined_call_operand.vmem [shape: bf16[2,2,8,16], index: 4, kind: output, shape index: {}]  }
   0x1   :  { %s778_s17 = smov 0  }
   0x2 LB: > { %s26_s18 = sadd.s32 1, %s741_s16  ;;  %p637_p0 = scmp.ge.s32.totalorder %s745_s17, 1  ;;  %s745_s17 = sphi %s778_s17, %s14_s17   ;;  %s741_s16 = sphi %s776_s16, %s838_s16   ;;  %s737_s15 = sphi %s774_s15, %s837_s15  }
   0x3   : > { %p28_p1 = scmp.ge.s32.totalorder %s26_s18, 2  ;;  %p209_p2 = scmp.lt.s32.totalorder %s745_s17, 3 }
   0x5   : > { %s840_s18 = smov (%p28_p1, %s26_s18), 0  ;;  %p210_p3 = pnand %p637_p0, %p209_p2 }
   0x6   : > { %p254_p4 = scmp.lt.s32.totalorder (!%p210_p3), %s737_s15, 1 }
   0x7   : > { %213 = sbr.rel (%p210_p3) target bundleno = 738 (0x2e2), region = 36 }
   0xc   : > { %v747_v0 = vmov 0.0   ;;  %s842_s15 = smov (!%p254_p4, %s737_s15), 1  ;;  %vm748_vm0 = vmmov 0   ;;  %vm290_vm1 = vcmask 130048   ;;  %vm394_vm2 = vcmask 64512  }
   0xd   : > { %665 = vmatprep.subr.bf16.mxu0 %v747_v0  ;;  %671 = vmatprep.subr.bf16.mxu1 %v747_v0  ;;  %s794_s19 = sshll.u32 %s842_s15, 3  ;;  %s274_s28 = scalar_lea.vmem %s835_s3, %s842_s15  ;;  %vm422_vm3 = vcmask 1043456   ;;  %vm514_vm4 = vcmask 125952  }
   0xe   : > { %667 = vmatprep.mubr.msk.bf16.mxu0 %vm748_vm0, %v747_v0  ;;  %673 = vmatprep.mubr.msk.bf16.mxu1 %vm748_vm0, %v747_v0  ;;  %s266_s22 = scalar_lea.vmem %s833_s1, %s794_s19  ;;  %s261_s25 = scalar_lea.vmem %s832_s0, %s794_s19  ;;  %v648_v9 = vld [vmem:[%s274_s28] ss:$0 sm:$0xff] }
   0xf   : > { %v286_v1 = vld [vmem:[%s266_s22] sm:$0xf]  ;;  %v287_v2 = vld [vmem:[%s266_s22 + $0x4] sm:$0xf]  ;;  %s271_s5 = scalar_lea.vmem %s834_s2, %s794_s19  ;;  %s282_s8 = scalar_lea.vmem %s836_s4, %s794_s19 }
  0x10   : > { %v295_v3 = vsel %vm290_vm1, %v286_v1, 0  ;;  %v341_v4 = vsel %vm290_vm1, %v287_v2, 0  ;;  %v284_v5 = vld [vmem:[%s261_s25] sm:$0xf]  ;;  %v285_v6 = vld [vmem:[%s261_s25 + $0x4] sm:$0xf] }
  0x11   : > { %666 = vmatpush3.bf16.xpose.msra.mxu0 %v295_v3  ;;  %672 = vmatpush3.bf16.xpose.msra.mxu1 %v341_v4  ;;  %v288_v32 = vld [vmem:[%s271_s5] sm:$0xf]  ;;  %v289_v33 = vld [vmem:[%s271_s5 + $0x4] sm:$0xf] }
  0x12   : > { %677 = vmatprep.subr.bf16.mxu0 %v747_v0  ;;  %683 = vmatprep.subr.bf16.mxu1 %v747_v0  ;;  %v424_v34 = vsel %vm422_vm3, %v288_v32, 0  ;;  %v470_v35 = vsel %vm422_vm3, %v289_v33, 0 }
  0x18   : > { %668 = vmatmul.mubr.msk.bf16.vlgmr.msra.gmra.mxu0 %vm290_vm1, %v284_v5  ;;  %674 = vmatmul.mubr.msk.bf16.vlgmr.msra.gmra.mxu1 %vm290_vm1, %v285_v6 }
  0x19   : > { %679 = vmatprep.mubr.msk.bf16.mxu0 %vm748_vm0, %v747_v0  ;;  %685 = vmatprep.mubr.msk.bf16.mxu1 %vm748_vm0, %v747_v0 }
  0x1a   : > { %678 = vmatpush3.bf16.msra.mxu0 %v424_v34  ;;  %684 = vmatpush3.bf16.msra.mxu1 %v470_v35 }
  0xd8   : > { %v331_v7 = vpop.f32.mrf.mxu0  ;;  %v377_v8 = vpop.f32.mrf.mxu1 }
  0xd9   : > { %v383_v10 = vmul.f32 0.25, %v331_v7  ;;  %v384_v11 = vmul.f32 0.25, %v377_v8 }
  0xda   : > { %v669_v12 = vpop.f32.mrf.mxu0  ;;  %v675_v13 = vpop.f32.mrf.mxu1 }
  0xdb   : > { %v392_v14 = vadd.f32 %v648_v9, %v383_v10  ;;  %v393_v15 = vadd.f32 %v648_v9, %v384_v11 }
  0xdc   : > { %v334_v16 = vpop.f32.mrf.mxu0  ;;  %v380_v17 = vpop.f32.mrf.mxu1 }
  0xdd   : > { %v395_v18 = vsel %vm394_vm2, %v392_v14, -inf  ;;  %v398_v21 = vsel %vm394_vm2, %v393_v15, -inf }
  0xde   : > { %v676_v19 = vpop.f32.mrf.mxu1  ;;  %396 = vmax.xlane.f32.xlu0 %v395_v18  ;;  %v670_v20 = vpop.f32.mrf.mxu0 }
  0xe2   : > { %399 = vmax.xlane.f32.xlu0 %v398_v21 }
 0x167   : > { %v397_v22 = vpop.xlane.xlu0 %396 }
 0x168   : > { %v401_v23 = vsub.f32 %v392_v14, %v397_v22 }
 0x16a   : > { %v403_v24 = vmul.f32 1.442695, %v401_v23 }
 0x16b   : > { %v400_v25 = vpop.xlane.xlu0 %399 }
 0x16c   : > { %715 = vpow2.f32 %v403_v24  ;;  %v402_v26 = vsub.f32 %v393_v15, %v400_v25 }
 0x16e   : > { %v405_v27 = vmul.f32 1.442695, %v402_v26 }
 0x170   : > { %717 = vpow2.f32 %v405_v27 }
 0x179   : > { %v716_v28 = vpop.eup %715 }
 0x17a   : > { %v407_v29 = vsel %vm394_vm2, %v716_v28, 0.0 }
 0x17b   : > { %408 = vadd.xlane.f32.xlu1 %v407_v29 }
 0x17d   : > { %v718_v30 = vpop.eup %717 }
 0x17e   : > { %v410_v31 = vsel %vm394_vm2, %v718_v30, 0.0 }
 0x17f   : > { %411 = vadd.xlane.f32.xlu1 %v410_v31 }
 0x204   : > { %v409_v36 = vpop.xlane.xlu1 %408 }
 0x205   : > { %719 = vrcp.f32 %v409_v36 }
 0x208   : > { %v412_v37 = vpop.xlane.xlu1 %411 }
 0x209   : > { %721 = vrcp.f32 %v412_v37 }
 0x212   : > { %v720_v38 = vpop.eup %719 }
 0x213   : > { %v415_v39 = vmul.f32 %v720_v38, %v716_v28 }
 0x215   : > { %v417_v40 = vpack.c.bf16 %v415_v39, %v415_v39 }
 0x216   : > { %v722_v41 = vpop.eup %721 }
 0x217   : > { %680 = vmatmul.mubr.msk.bf16.vlgmr.msra.gmra.mxu0 %vm394_vm2, %v417_v40  ;;  %v416_v42 = vmul.f32 %v722_v41, %v718_v30 }
 0x219   : > { %v418_v43 = vpack.c.bf16 %v416_v42, %v416_v42 }
 0x21b   : > { %686 = vmatmul.mubr.msk.bf16.vlgmr.msra.gmra.mxu1 %vm394_vm2, %v418_v43 }
 0x2d7   : > { %v460_v44 = vpop.f32.mrf.mxu0 }
 0x2d8   : > { %v512_v45 = vpack.c.bf16 %v460_v44, %v460_v44 }
 0x2d9   : > { %v681_v46 = vpop.f32.mrf.mxu0 }
 0x2da   : > { %515 = vst.msk [vmem:[%s282_s8] sm:$0xf] %vm514_vm4, %v512_v45 }
 0x2db   : > { %v463_v47 = vpop.f32.mrf.mxu0  ;;  %v506_v48 = vpop.f32.mrf.mxu1 }
 0x2dc   : > { %v513_v49 = vpack.c.bf16 %v506_v48, %v506_v48 }
 0x2dd   : > { %v682_v50 = vpop.f32.mrf.mxu0  ;;  %v687_v51 = vpop.f32.mrf.mxu1 }
 0x2de   : > { %516 = vst.msk [vmem:[%s282_s8 + $0x4] sm:$0xf] %vm514_vm4, %v513_v49 }
 0x2df   : > { %v509_v52 = vpop.f32.mrf.mxu1 }
 0x2e1   : > { %v688_v53 = vpop.f32.mrf.mxu1 }
 0x2e2 PF: > { %s14_s17 = sadd.s32 1, %s745_s17   ;;  %s837_s15 = smov %s741_s16 }
 0x2e3   : > { %p11_p5 = scmp.ge.s32.totalorder %s14_s17, 4   ;;  %s838_s16 = smov %s840_s18 }
 0x2e5   :  { %13 = sbr.rel (!%p11_p5) target bundleno = 2 (0x2), region = 75 }

// kernel: bert_class_forward.15
= control target key start
LH: loop header
LB: loop body
LE: loop exit
PB: predicated region body
PF: predicated region fallthrough
CT: control target
= control target key end

     0   :  { %v235_v1 = vmov 0.0   ;;  %vm236_vm0 = vmmov 0   ;;  %s294_s0 = inlined_call_operand.vmem [shape: bf16[2,32], index: 0, kind: input, shape index: {}]   ;;  %s295_s1 = inlined_call_operand.vmem [shape: bf16[32,32], index: 1, kind: input, shape index: {}]   ;;  %s296_s2 = inlined_call_operand.vmem [shape: f32[1,32], index: 2, kind: input, shape index: {}]   ;;  %s297_s3 = inlined_call_operand.vmem [shape: bf16[32,3], index: 3, kind: input, shape index: {}]   ;;  %s298_s4 = inlined_call_operand.vmem [shape: f32[1,3], index: 4, kind: input, shape index: {}]   ;;  %s299_s5 = inlined_call_operand.hbm [shape: f32[2,3], index: 5, kind: output, shape index: {}]  }
   0x1   :  { %v207_v0 = vld [vmem:[%s295_s1 + $0x8] sm:$0xff]   ;;  %188 = vmatprep.subr.bf16.mxu0 %v235_v1  ;;  %196 = vmatprep.subr.bf16.mxu1 %v235_v1  ;;  %v208_v2 = vld [vmem:[%s295_s1] sm:$0xff]  }
   0x2   :  { %189 = vmatpush3.bf16.msra.mxu0 %v207_v0  ;;  %192 = vmatprep.mubr.msk.bf16.mxu0 %vm236_vm0, %v235_v1 }
   0x3   :  { %190 = vmatprep.subr.bf16.mxu0 %v235_v1  ;;  %200 = vmatprep.mubr.msk.bf16.mxu1 %vm236_vm0, %v235_v1 }
   0x4   :  { %10 = vsyncpa [#allocation3], 0  ;;  %v22_v3 = vld [vmem:[%s294_s0] sm:$0x1]  ;;  %vm46_vm1 = vcmask 261120   ;;  %v209_v4 = vld [vmem:[%s297_s3 + $0x8] sm:$0xff]  }
   0x5   :  { %197 = vmatpush3.bf16.msra.mxu1 %v209_v4  ;;  %v210_v5 = vld [vmem:[%s297_s3] sm:$0xff]   ;;  %s237_s3 = smov [#allocation2]   ;;  %vm158_vm2 = vcmask 17408  }
   0x6   :  { %191 = vmatpush3.bf16.msra.mxu0 %v208_v2  ;;  %198 = vmatprep.subr.bf16.mxu1 %v235_v1  ;;  %v174_v6 = vld [vmem:[%s296_s2] ss:$0 sm:$0xff]  ;;  %s166_s30 = sshll.u32 %s237_s3, 4  ;;  %s167_s30 = int_to_ptr.vmem [resolvable:$true] %s166_s30 }
   0x7   :  { %v178_v14 = vld [vmem:[%s298_s4] ss:$0 sm:$0xff]  ;;  %s213_s2 = scalar_lea.vmem %s167_s30, 32  ;;  %p218_p1 = scmp.lt.s32.totalorder %s167_s30, %s167_s30 }
   0x8   :  { %p214_p0 = scmp.ne.s32.totalorder %s167_s30, %s213_s2  ;;  %p219_p2 = scmp.lt.s32.totalorder %s213_s2, %s213_s2 }
   0x9   :  { %193 = vmatmul.mubr.msk.bf16.vlgmr.msra.gmra.mxu0 %vm46_vm1, %v22_v3  ;;  %199 = vmatpush3.bf16.msra.mxu1 %v210_v5 }
   0xa   :  { %p220_p3 = por %p219_p2, %p218_p1 }
   0xc   :  { %p221_p4 = pnand %p220_p3, %p214_p0 }
  0xc9   :  { %v84_v7 = vpop.f32.mrf.mxu0 }
  0xca   :  { %v85_v8 = vadd.f32 %v174_v6, %v84_v7 }
  0xcb   :  { %v194_v9 = vpop.f32.mrf.mxu0 }
  0xcc   :  { %211 = vtanh.f32 %v85_v8 }
  0xcd   :  { %v87_v10 = vpop.f32.mrf.mxu0 }
  0xcf   :  { %v195_v11 = vpop.f32.mrf.mxu0 }
  0xd9   :  { %v212_v12 = vpop.eup %211 }
  0xda   :  { %v91_v13 = vpack.c.bf16 %v212_v12, %v212_v12 }
  0xdc   :  { %201 = vmatmul.mubr.msk.bf16.vlgmr.msra.gmra.mxu1 %vm46_vm1, %v91_v13 }
 0x19c   :  { %v152_v15 = vpop.f32.mrf.mxu1 }
 0x19d   :  { %v153_v16 = vadd.f32 %v178_v14, %v152_v15 }
 0x19e   :  { %v202_v17 = vpop.f32.mrf.mxu1 }
 0x19f   :  { %159 = vst.msk [vmem:[#allocation2] sm:$0x3] %vm158_vm2, %v153_v16 }
 0x1a0   :  { %v155_v18 = vpop.f32.mrf.mxu1 }
 0x1a1   :  { %224 = shalt.err (!%p221_p4)
}
 0x1a2   :  { %169 = dma.vmem_to_hbm [thread:$0]  %s167_s30, 32, %s299_s5, [#allocation3]   ;;  %v203_v19 = vpop.f32.mrf.mxu1 }
 0x1a3   :  { %233 = dma.done.wait [#allocation3], 32  }
 0x1a4   :  { %234 = vsyncadd [#allocation3], 4294967264 }
 0x1a5   :  { %173 = vsyncpa [#allocation3], 1 }

// kernel: bert_class_forward.11
= control target key start
LH: loop header
LB: loop body
LE: loop exit
PB: predicated region body
PF: predicated region fallthrough
CT: control target
= control target key end

     0   :  { %s1050_s21 = smov 0   ;;  %s1052_s22 = smov 0   ;;  %s1142_s0 = inlined_call_operand.vmem [shape: bf16[2,8,32], index: 0, kind: input, shape index: {}]   ;;  %s1143_s1 = inlined_call_operand.vmem [shape: bf16[2,8,32], index: 1, kind: input, shape index: {}]   ;;  %s1144_s2 = inlined_call_operand.vmem [shape: bf16[32,32], index: 2, kind: input, shape index: {}]   ;;  %s1145_s3 = inlined_call_operand.vmem [shape: f32[1,32], index: 3, kind: input, shape index: {}]   ;;  %s1146_s4 = inlined_call_operand.vmem [shape: f32[1,32], index: 4, kind: input, shape index: {}]   ;;  %s1147_s5 = inlined_call_operand.vmem [shape: f32[1,32], index: 5, kind: input, shape index: {}]   ;;  %s1148_s6 = inlined_call_operand.vmem [shape: bf16[32,64], index: 6, kind: input, shape index: {}]   ;;  %s1149_s7 = inlined_call_operand.vmem [shape: f32[1,64], index: 7, kind: input, shape index: {}]   ;;  %s1150_s8 = inlined_call_operand.vmem [shape: bf16[64,32], index: 8, kind: input, shape index: {}]   ;;  %s1151_s9 = inlined_call_operand.vmem [shape: f32[1,32], index: 9, kind: input, shape index: {}]   ;;  %s1152_s10 = inlined_call_operand.vmem [shape: f32[1,32], index: 10, kind: input, shape index: {}]   ;;  %s1153_s11 = inlined_call_operand.vmem [shape: f32[1,32], index: 11, kind: input, shape index: {}]   ;;  %s1154_s12 = inlined_call_operand.vmem [shape: bf16[2,8,32], index: 12, kind: output, shape index: {}]  }
   0x1   :  { %s1054_s23 = smov 0  }
   0x2 LB: > { %s34_s24 = sadd.s32 1, %s977_s22  ;;  %p856_p0 = scmp.ge.s32.totalorder %s981_s23, 1  ;;  %s981_s23 = sphi %s1054_s23, %s22_s23   ;;  %s977_s22 = sphi %s1052_s22, %s1156_s22   ;;  %s973_s21 = sphi %s1050_s21, %s1155_s21  }
   0x3   : > { %p36_p1 = scmp.ge.s32.totalorder %s34_s24, 2  ;;  %p394_p2 = scmp.lt.s32.totalorder %s981_s23, 3 }
   0x5   : > { %s1158_s24 = smov (%p36_p1, %s34_s24), 0  ;;  %p395_p3 = pnand %p856_p0, %p394_p2 }
   0x6   : > { %p447_p4 = scmp.lt.s32.totalorder (!%p395_p3), %s973_s21, 1 }
   0x7   : > { %398 = sbr.rel (%p395_p3) target bundleno = 1261 (0x4ed), region = 68 }
   0xc   : > { %v945_v0 = vld [vmem:[%s1144_s2 + $0x8] sm:$0xff]   ;;  %v983_v1 = vmov 0.0   ;;  %v946_v2 = vld [vmem:[%s1144_s2] sm:$0xff]   ;;  %vm984_vm0 = vmmov 0   ;;  %s1160_s21 = smov (!%p447_p4, %s973_s21), 1  ;;  %vm493_vm1 = vcmask 261120  }
   0xd   : > { %891 = vmatprep.subr.bf16.mxu1 %v983_v1  ;;  %907 = vmatprep.subr.bf16.mxu0 %v983_v1  ;;  %s1074_s29 = sshll.u32 %s1160_s21, 2  ;;  %v860_v5 = vld [vmem:[%s1145_s3] ss:$0 sm:$0xff]  ;;  %v947_v19 = vld [vmem:[%s1148_s6 + $0x8] sm:$0xff]   ;;  %v949_v31 = vld [vmem:[%s1150_s8 + $0x18] sm:$0xff]   ;;  %vm686_vm2 = vcmask 523264  }
   0xe   : > { %892 = vmatpush3.bf16.msra.mxu1 %v945_v0  ;;  %895 = vmatprep.mubr.msk.bf16.mxu1 %vm984_vm0, %v983_v1  ;;  %s460_s14 = scalar_lea.vmem %s1143_s1, %s1074_s29  ;;  %s453_s17 = scalar_lea.vmem %s1142_s0, %s1074_s29  ;;  %v948_v20 = vld [vmem:[%s1148_s6] sm:$0xff]   ;;  %v950_v32 = vld [vmem:[%s1150_s8 + $0x10] sm:$0xff]   ;;  %v951_v33 = vld [vmem:[%s1150_s8 + $0x8] sm:$0xff]   ;;  %vm761_vm3 = vcmask 257024  }
   0xf   : > { %893 = vmatprep.subr.bf16.mxu1 %v983_v1  ;;  %915 = vmatprep.mubr.msk.bf16.mxu0 %vm984_vm0, %v983_v1  ;;  %v469_v3 = vld [vmem:[%s460_s14] sm:$0xf]  ;;  %s467_s18 = scalar_lea.vmem %s1154_s12, %s1074_s29 }
  0x10   : > { %v537_v4 = vld [vmem:[%s453_s17] sm:$0xf]  ;;  %908 = vmatpush3.bf16.msra.mxu0 %v949_v31 }
  0x11   : > { %v538_v6 = vunpack.c.l.bf16 %v537_v4  ;;  %v864_v25 = vld [vmem:[%s1146_s4] ss:$0 sm:$0xff]  ;;  %909 = vmatprep.subr.bf16.mxu0 %v983_v1 }
  0x12   : > { %894 = vmatpush3.bf16.msra.mxu1 %v946_v2  ;;  %v865_v27 = vld [vmem:[%s1147_s5] ss:$0 sm:$0xff] }
  0x13   : > { %899 = vmatprep.subr.bf16.mxu1 %v983_v1  ;;  %v952_v34 = vld [vmem:[%s1150_s8] sm:$0xff]  }
  0x14   : > { %910 = vmatpush3.bf16.msra.mxu0 %v950_v32  ;;  %v866_v35 = vld [vmem:[%s1149_s7] ss:$0 sm:$0xff] }
  0x15   : > { %896 = vmatmul.mubr.msk.bf16.vlgmr.msra.gmra.mxu1 %vm493_vm1, %v469_v3  ;;  %911 = vmatprep.subr.bf16.mxu0 %v983_v1  ;;  %v870_v51 = vld [vmem:[%s1151_s9] ss:$0 sm:$0xff] }
  0x16   : > { %903 = vmatprep.mubr.msk.bf16.mxu1 %vm984_vm0, %v983_v1  ;;  %900 = vmatpush3.bf16.msra.mxu1 %v947_v19  ;;  %v876_v4 = vld [vmem:[%s1152_s10] ss:$0 sm:$0xff] }
  0x17   : > { %901 = vmatprep.subr.bf16.mxu1 %v983_v1 }
  0x18   : > { %912 = vmatpush3.bf16.msra.mxu0 %v951_v33 }
  0x19   : > { %913 = vmatprep.subr.bf16.mxu0 %v983_v1 }
  0x1a   : > { %902 = vmatpush3.bf16.msra.mxu1 %v948_v20 }
  0x1c   : > { %914 = vmatpush3.bf16.msra.mxu0 %v952_v34 }
  0xd5   : > { %v531_v7 = vpop.f32.mrf.mxu1 }
  0xd6   : > { %v532_v8 = vadd.f32 %v860_v5, %v531_v7 }
  0xd7   : > { %v897_v9 = vpop.f32.mrf.mxu1 }
  0xd8   : > { %v539_v10 = vadd.f32 %v538_v6, %v532_v8  ;;  %v877_v6 = vld [vmem:[%s1153_s11] ss:$0 sm:$0xff] }
  0xd9   : > { %v534_v11 = vpop.f32.mrf.mxu1 }
  0xda   : > { %v542_v12 = vsel %vm493_vm1, %v539_v10, 0.0 }
  0xdb   : > { %v898_v13 = vpop.f32.mrf.mxu1  ;;  %543 = vadd.xlane.f32.xlu0 %v542_v12 }
 0x164   : > { %v544_v14 = vpop.xlane.xlu0 %543 }
 0x165   : > { %v546_v15 = vmul.f32 0.03125, %v544_v14 }
 0x167   : > { %v547_v16 = vsub.f32 %v539_v10, %v546_v15 }
 0x169   : > { %v548_v17 = vmul.f32 %v547_v16, %v547_v16 }
 0x16b   : > { %v549_v18 = vsel %vm493_vm1, %v548_v17, 0.0 }
 0x16c   : > { %550 = vadd.xlane.f32.xlu0 %v549_v18 }
 0x1f5   : > { %v551_v21 = vpop.xlane.xlu0 %550 }
 0x1f6   : > { %v552_v22 = vmul.f32 0.03125, %v551_v21 }
 0x1f8   : > { %v553_v23 = vadd.f32 1e-12, %v552_v22 }
 0x1fa   : > { %953 = vrsqrt.f32 %v553_v23 }
 0x207   : > { %v954_v24 = vpop.eup %953 }
 0x208   : > { %v555_v26 = vmul.f32 %v954_v24, %v547_v16 }
 0x20a   : > { %v562_v28 = vmul.f32 %v864_v25, %v555_v26 }
 0x20c   : > { %v569_v29 = vadd.f32 %v865_v27, %v562_v28 }
 0x20e   : > { %v570_v30 = vpack.c.bf16 %v569_v29, %v569_v29 }
 0x210   : > { %904 = vmatmul.mubr.msk.bf16.vlgmr.msra.gmra.mxu1 %vm493_vm1, %v570_v30 }
 0x2d0   : > { %v631_v36 = vpop.f32.mrf.mxu1 }
 0x2d1   : > { %v632_v37 = vadd.f32 %v866_v35, %v631_v36 }
 0x2d2   : > { %v905_v38 = vpop.f32.mrf.mxu1 }
 0x2d3   : > { %v638_v39 = vmul.f32 0.044715, %v632_v37  ;;  %v637_v47 = vmul.f32 0.5, %v632_v37 }
 0x2d4   : > { %v634_v40 = vpop.f32.mrf.mxu1 }
 0x2d5   : > { %v639_v41 = vmul.f32 %v638_v39, %v632_v37 }
 0x2d6   : > { %v906_v42 = vpop.f32.mrf.mxu1 }
 0x2d7   : > { %v640_v43 = vmul.f32 %v639_v41, %v632_v37 }
 0x2d9   : > { %v641_v44 = vadd.f32 %v640_v43, %v632_v37 }
 0x2db   : > { %v642_v45 = vmul.f32 0.7978845, %v641_v44 }
 0x2dd   : > { %955 = vtanh.f32 %v642_v45 }
 0x2ea   : > { %v956_v46 = vpop.eup %955 }
 0x2eb   : > { %v644_v48 = vadd.f32 1.0, %v956_v46 }
 0x2ed   : > { %v645_v49 = vmul.f32 %v644_v48, %v637_v47 }
 0x2ef   : > { %v646_v50 = vpack.c.bf16 %v645_v49, %v645_v49 }
 0x2f1   : > { %916 = vmatmul.mubr.msk.bf16.vlgmr.msra.gmra.mxu0 %vm686_vm2, %v646_v50 }
 0x3b1   : > { %v724_v52 = vpop.f32.mrf.mxu0 }
 0x3b2   : > { %v725_v53 = vadd.f32 %v870_v51, %v724_v52 }
 0x3b3   : > { %v917_v54 = vpop.f32.mrf.mxu0 }
 0x3b4   : > { %v730_v55 = vadd.f32 %v725_v53, %v569_v29 }
 0x3b5   : > { %v727_v56 = vpop.f32.mrf.mxu0 }
 0x3b6   : > { %v733_v57 = vsel %vm493_vm1, %v730_v55, 0.0 }
 0x3b7   : > { %734 = vadd.xlane.f32.xlu1 %v733_v57  ;;  %v918_v58 = vpop.f32.mrf.mxu0 }
 0x440   : > { %v735_v59 = vpop.xlane.xlu1 %734 }
 0x441   : > { %v736_v60 = vmul.f32 0.03125, %v735_v59 }
 0x443   : > { %v737_v61 = vsub.f32 %v730_v55, %v736_v60 }
 0x445   : > { %v738_v62 = vmul.f32 %v737_v61, %v737_v61 }
 0x447   : > { %v739_v63 = vsel %vm493_vm1, %v738_v62, 0.0 }
 0x448   : > { %740 = vadd.xlane.f32.xlu1 %v739_v63 }
 0x4d1   : > { %v741_v0 = vpop.xlane.xlu1 %740 }
 0x4d2   : > { %v742_v1 = vmul.f32 0.03125, %v741_v0 }
 0x4d4   : > { %v743_v2 = vadd.f32 1e-12, %v742_v1 }
 0x4d6   : > { %957 = vrsqrt.f32 %v743_v2 }
 0x4e3   : > { %v958_v3 = vpop.eup %957 }
 0x4e4   : > { %v745_v5 = vmul.f32 %v958_v3, %v737_v61 }
 0x4e6   : > { %v752_v7 = vmul.f32 %v876_v4, %v745_v5 }
 0x4e8   : > { %v759_v8 = vadd.f32 %v877_v6, %v752_v7 }
 0x4ea   : > { %v760_v9 = vpack.c.bf16 %v759_v8, %v759_v8 }
 0x4ec   : > { %762 = vst.msk [vmem:[%s467_s18] sm:$0xf] %vm761_vm3, %v760_v9 }
 0x4ed PF: > { %s22_s23 = sadd.s32 1, %s981_s23   ;;  %s1155_s21 = smov %s977_s22 }
 0x4ee   : > { %p19_p5 = scmp.ge.s32.totalorder %s22_s23, 4   ;;  %s1156_s22 = smov %s1158_s24 }
 0x4f0   :  { %21 = sbr.rel (!%p19_p5) target bundleno = 2 (0x2), region = 101 }

</bundles_post_ra>
